<compile_context>
chip_gen: v6e
topology: v6e:2x2x1
jax: 0.10.0
libtpu: 0.0.40
codegen_flags: <defaults>
</compile_context>

<pallas_src>
import jax
import jax.numpy as jnp
from jax import lax
from jax.experimental import pallas as pl
from jax.experimental.pallas import tpu as pltpu


_VMEM_TILE_BUDGET = 24 * 1024 * 1024   # design target for the working set (all gens)
_VMEM_LIMIT_BYTES = 32 * 1024 * 1024   # explicit scoped-VMEM limit (<= v7x physical)


def _round_up(x, m):
    return (x + m - 1) // m * m


# ---------------- kernels ----------------

def _matmul_bias_relu_kernel(p_ref, w_ref, b_ref, o_ref):
    """Full-K path: one (tm, tn) output tile = relu(P @ W + b). No scratch, no phases."""
    acc = jnp.dot(p_ref[...], w_ref[...], preferred_element_type=jnp.float32)
    o_ref[...] = jnp.maximum(acc + b_ref[...], 0.0).astype(o_ref.dtype)


def _matmul_bias_relu_ksplit_kernel(p_ref, w_ref, b_ref, o_ref):
    """K-split fallback: accumulate directly into the resident f32 o_ref (no scratch)."""
    kk = pl.program_id(2)
    part = jnp.dot(p_ref[...], w_ref[...], preferred_element_type=jnp.float32)

    @pl.when(kk == 0)
    def _():
        o_ref[...] = part

    @pl.when(kk > 0)
    def _():
        o_ref[...] += part

    @pl.when(kk == pl.num_programs(2) - 1)
    def _():
        o_ref[...] = jnp.maximum(o_ref[...] + b_ref[...], 0.0)


# ---------------- tile selection ----------------

def _pick_tiles(m, k_p, cout_p):
    # tn: full padded Cout when small enough -> patch matrix read from HBM only once.
    if cout_p <= 512:
        tn = cout_p
    elif cout_p % 512 == 0:
        tn = 512
    elif cout_p % 256 == 0:
        tn = 256
    else:
        tn = 128

    def vmem_bytes(tm, tk):
        # 2x-buffered bf16 patches + 2x-buffered bf16 weights + 2x-buffered f32 out + bias
        return 2 * tm * tk * 2 + 2 * tk * tn * 2 + 2 * tm * tn * 4 + tn * 4

    # tk: prefer the whole padded K so the reduction grid axis disappears entirely.
    if vmem_bytes(256, k_p) <= _VMEM_TILE_BUDGET:
        tk = k_p
    elif k_p % 512 == 0:
        tk = 512
    elif k_p % 256 == 0:
        tk = 256
    else:
        tk = 128

    # tm: as large as the budget allows, but keep >=2 M blocks (megacore on v7x) and
    # don't pad tiny problems up to a huge tile.
    candidates = [t for t in (1024, 512, 256, 128) if vmem_bytes(t, tk) <= _VMEM_TILE_BUDGET]
    if not candidates:
        candidates = [128]
    tm = candidates[0]
    for t in candidates:
        if _round_up(m, t) // t >= 2:
            tm = t
            break
    else:
        tm = min(tm, max(128, _round_up(m, 128)))
    return tm, tk, tn


# ---------------- reference (pure JAX, f32) ----------------

def _reference(x_nchw, weight_oihw, gamma, beta, running_mean, running_var,
               *, stride, padding, dilation, eps=1e-5):
    """Pure-JAX f32 reference matching PyTorch semantics (eval-mode BN)."""
    y = lax.conv_general_dilated(
        x_nchw, weight_oihw,
        window_strides=(stride, stride),
        padding=((padding, padding), (padding, padding)),
        rhs_dilation=(dilation, dilation),
        dimension_numbers=("NCHW", "OIHW", "NCHW"))
    inv = gamma / jnp.sqrt(running_var + eps)
    y = y * inv[None, :, None, None] + (beta - running_mean * inv)[None, :, None, None]
    return jnp.maximum(y, 0.0)


# ---------------- wrapper ----------------

def basic_conv2d(x_nchw, weight_oihw, gamma, beta, running_mean, running_var,
                 *, stride=1, padding=0, dilation=1, eps=1e-5,
                 compute_dtype=jnp.bfloat16, allow_xla_fallback=False):
    """Forward pass of BasicConv2d. Input/output are NCHW float32 (PyTorch convention)."""
    n, cin, h, w = x_nchw.shape
    cout, cin_w, kh, kw = weight_oihw.shape
    assert cin_w == cin
    ho = (h + 2 * padding - dilation * (kh - 1) - 1) // stride + 1
    wo = (w + 2 * padding - dilation * (kw - 1) - 1) // stride + 1

    m = n * ho * wo
    k = kh * kw * cin
    cout_p = _round_up(cout, 128)
    k_p = _round_up(k, 128)

    # Escape hatch: when lane padding would dominate (Cout << 128 or K << 128),
    # the MXU mostly multiplies zeros -> let XLA's conv handle it. Off by default.
    if allow_xla_fallback and (cout_p >= 4 * cout or k_p >= 4 * k):
        return _reference(x_nchw, weight_oihw, gamma, beta, running_mean, running_var,
                          stride=stride, padding=padding, dilation=dilation, eps=eps)

    # ---- eval-mode BN folding: scale into the weights, only a bias-add remains ----
    scale = (gamma.astype(jnp.float32)
             * lax.rsqrt(running_var.astype(jnp.float32) + eps))
    bias = beta.astype(jnp.float32) - running_mean.astype(jnp.float32) * scale
    w_folded = weight_oihw.astype(jnp.float32) * scale[:, None, None, None]      # OIHW
    # (KH, KW, Cin, Cout) -> (K, Cout); row ordering (i, j, cin) matches the patches.
    w_mat = jnp.transpose(w_folded, (2, 3, 1, 0)).reshape(k, cout).astype(compute_dtype)

    # ---- im2col in the wrapper, built directly in bf16 to halve HBM traffic ----
    x_nhwc = jnp.transpose(x_nchw, (0, 2, 3, 1)).astype(compute_dtype)
    x_pad = jnp.pad(x_nhwc, ((0, 0), (padding, padding), (padding, padding), (0, 0)))
    taps = []
    for i in range(kh):
        for j in range(kw):
            r0 = i * dilation
            c0 = j * dilation
            taps.append(x_pad[:, r0:r0 + (ho - 1) * stride + 1:stride,
                                 c0:c0 + (wo - 1) * stride + 1:stride, :])
    patches = jnp.concatenate(taps, axis=-1).reshape(m, k)

    # ---- tiles (lane-dense output, MXU-friendly, VMEM-budgeted) ----
    tm, tk, tn = _pick_tiles(m, k_p, cout_p)
    m_p = _round_up(m, tm)

    patches_p = jnp.pad(patches, ((0, m_p - m), (0, k_p - k)))
    w_p = jnp.pad(w_mat, ((0, k_p - k), (0, cout_p - cout)))
    bias_p = jnp.pad(bias, (0, cout_p - cout)).reshape(1, cout_p)

    if tk == k_p:
        # Single collapsed-K contraction; weights become VMEM-resident (constant block
        # index) and the patch strip is streamed exactly once.
        grid = (m_p // tm, cout_p // tn)
        out = pl.pallas_call(
            _matmul_bias_relu_kernel,
            out_shape=jax.ShapeDtypeStruct((m_p, cout_p), jnp.float32),
            grid_spec=pltpu.PrefetchScalarGridSpec(
                num_scalar_prefetch=0,
                grid=grid,
                in_specs=[pl.BlockSpec((tm, tk), lambda i, j: (i, 0)),   # patches
                          pl.BlockSpec((tk, tn), lambda i, j: (0, j)),   # folded weights
                          pl.BlockSpec((1, tn), lambda i, j: (0, j))],   # BN bias
                out_specs=pl.BlockSpec((tm, tn), lambda i, j: (i, j))),
            compiler_params=pltpu.CompilerParams(
                dimension_semantics=("parallel", "parallel"),
                vmem_limit_bytes=_VMEM_LIMIT_BYTES),
        )(patches_p, w_p, bias_p)
    else:
        # Very large K: keep a reduction axis, accumulate directly into the resident
        # f32 output block (no scratch), bias + ReLU applied in place at the last step.
        grid = (m_p // tm, cout_p // tn, k_p // tk)
        out = pl.pallas_call(
            _matmul_bias_relu_ksplit_kernel,
            out_shape=jax.ShapeDtypeStruct((m_p, cout_p), jnp.float32),
            grid_spec=pltpu.PrefetchScalarGridSpec(
                num_scalar_prefetch=0,
                grid=grid,
                in_specs=[pl.BlockSpec((tm, tk), lambda i, j, kk: (i, kk)),
                          pl.BlockSpec((tk, tn), lambda i, j, kk: (kk, j)),
                          pl.BlockSpec((1, tn), lambda i, j, kk: (0, j))],
                out_specs=pl.BlockSpec((tm, tn), lambda i, j, kk: (i, j))),
            compiler_params=pltpu.CompilerParams(
                dimension_semantics=("parallel", "parallel", "arbitrary"),
                vmem_limit_bytes=_VMEM_LIMIT_BYTES),
        )(patches_p, w_p, bias_p)

    out = out[:m, :cout].reshape(n, ho, wo, cout)
    return jnp.transpose(out, (0, 3, 1, 2))


if __name__ == "__main__":
    # BasicConv2d(in_planes=4, out_planes=8, kernel_size=3, stride=1, padding=1)
    N, CIN, H, W = 2, 4, 16, 16
    COUT, KH, KW = 8, 3, 3
    STRIDE, PADDING, DILATION = 1, 1, 1

    key = jax.random.PRNGKey(0)
    kx, kw_, kg, kb, km, kv = jax.random.split(key, 6)

    x = jax.random.normal(kx, (N, CIN, H, W), dtype=jnp.float32)
    weight = jax.random.normal(kw_, (COUT, CIN, KH, KW), dtype=jnp.float32) * 0.1
    gamma = 1.0 + 0.1 * jax.random.normal(kg, (COUT,), dtype=jnp.float32)
    beta = 0.05 * jax.random.normal(kb, (COUT,), dtype=jnp.float32)
    running_mean = 0.1 * jax.random.normal(km, (COUT,), dtype=jnp.float32)
    running_var = 1.0 + 0.1 * jnp.abs(jax.random.normal(kv, (COUT,), dtype=jnp.float32))

    out = basic_conv2d(x, weight, gamma, beta, running_mean, running_var,
                       stride=STRIDE, padding=PADDING, dilation=DILATION)
    out = jax.block_until_ready(out)

    ref = _reference(x, weight, gamma, beta, running_mean, running_var,
                     stride=STRIDE, padding=PADDING, dilation=DILATION)
    assert out.shape == ref.shape == (N, COUT, H, W)
    # Tolerance accounts for bf16 MXU inputs (f32 accumulation) vs an all-f32 reference.
    assert jnp.allclose(out, ref, atol=5e-2, rtol=5e-2), "mismatch vs reference"

    print("KERNEL_OK")
</pallas_src>

<mosaic_0001>
module attributes {stable_mosaic.version = 11 : i64} {
  func.func @_matmul_bias_relu_kernel(%arg0: i32, %arg1: i32, %arg2: memref<256x128xbf16, #tpu.memory_space<vmem>>, %arg3: memref<128x128xbf16, #tpu.memory_space<vmem>>, %arg4: memref<1x128xf32, #tpu.memory_space<vmem>>, %arg5: memref<256x128xf32, #tpu.memory_space<vmem>>) attributes {dimension_semantics = [#tpu.dimension_semantics<parallel>, #tpu.dimension_semantics<parallel>], iteration_bounds = array<i64: 2, 1>, scalar_prefetch = 0 : i64, scratch_operands = 0 : i64, tpu.core_type = #tpu.core_type<tc>, window_params = [{transform_indices = @transform_0, window_bounds = array<i64: 256, 128>}, {transform_indices = @transform_1, window_bounds = array<i64: 128, 128>}, {transform_indices = @transform_2, window_bounds = array<i64: 1, 128>}, {transform_indices = @transform_3, window_bounds = array<i64: 256, 128>}]} {
    %c0 = arith.constant 0 : index
    %c0_0 = arith.constant 0 : index
    %0 = vector.load %arg2[%c0, %c0_0] : memref<256x128xbf16, #tpu.memory_space<vmem>>, vector<256x128xbf16>
    %c0_1 = arith.constant 0 : index
    %c0_2 = arith.constant 0 : index
    %1 = vector.load %arg3[%c0_1, %c0_2] : memref<128x128xbf16, #tpu.memory_space<vmem>>, vector<128x128xbf16>
    %cst = arith.constant dense<0.000000e+00> : vector<256x128xf32>
    %2 = tpu.matmul %0, %1, %cst {dimension_numbers = #tpu.dot_dimension_numbers<[1], [0], [0], [1], [0, 0, 1, 1], [], []>} : vector<256x128xbf16>, vector<128x128xbf16>, vector<256x128xf32> -> vector<256x128xf32>
    %c0_3 = arith.constant 0 : index
    %c0_4 = arith.constant 0 : index
    %3 = vector.load %arg4[%c0_3, %c0_4] : memref<1x128xf32, #tpu.memory_space<vmem>>, vector<1x128xf32>
    %4 = vector.broadcast %3 : vector<1x128xf32> to vector<256x128xf32>
    %5 = arith.addf %2, %4 : vector<256x128xf32>
    %cst_5 = arith.constant 0.000000e+00 : f32
    %6 = vector.broadcast %cst_5 : f32 to vector<256x128xf32>
    %7 = arith.maximumf %5, %6 : vector<256x128xf32>
    %c0_6 = arith.constant 0 : index
    %c0_7 = arith.constant 0 : index
    %8 = vector.load %arg5[%c0_6, %c0_7] : memref<256x128xf32, #tpu.memory_space<vmem>>, vector<256x128xf32>
    tpu.vector_store %arg5[%c0_6, %c0_7], %7 {strides = array<i32>} : memref<256x128xf32, #tpu.memory_space<vmem>>, vector<256x128xf32>,
    return
  }
  func.func @transform_0(%arg0: i32, %arg1: i32) -> (i32, i32) {
    %c0_i32 = arith.constant 0 : i32
    %c0_i32_0 = arith.constant 0 : i32
    return %arg0, %c0_i32 : i32, i32
  }
  func.func @transform_1(%arg0: i32, %arg1: i32) -> (i32, i32) {
    %c0_i32 = arith.constant 0 : i32
    %c0_i32_0 = arith.constant 0 : i32
    return %c0_i32, %arg1 : i32, i32
  }
  func.func @transform_2(%arg0: i32, %arg1: i32) -> (i32, i32) {
    %c0_i32 = arith.constant 0 : i32
    %c0_i32_0 = arith.constant 0 : i32
    return %c0_i32, %arg1 : i32, i32
  }
  func.func @transform_3(%arg0: i32, %arg1: i32) -> (i32, i32) {
    %c0_i32 = arith.constant 0 : i32
    return %arg0, %arg1 : i32, i32
  }
}

</mosaic_0001>

<bundles_post_ra>
// kernel: tpu_custom_call.1
= control target key start
LH: loop header
LB: loop body
LE: loop exit
PB: predicated region body
PF: predicated region fallthrough
CT: control target
= control target key end

     0   :  { %8 = vsyncpa [#allocation3], 0  ;;  %s1467_s0 = inlined_call_operand.hbm [shape: bf16[512,128], index: 0, kind: input, shape index: {}]   ;;  %s1468_s1 = inlined_call_operand.hbm [shape: bf16[128,128], index: 1, kind: input, shape index: {}]   ;;  %s1469_s2 = inlined_call_operand.vmem [shape: f32[1,128], index: 2, kind: input, shape index: {}]   ;;  %s1470_s3 = inlined_call_operand.hbm [shape: f32[512,128], index: 3, kind: output, shape index: {}]  }
   0x1   :  { %10 = vsyncpa [#allocation3 + $0x1], 0 }
   0x2   :  { %11 = vsyncpa [#allocation6], 0 }
   0x3   :  { %12 = vsyncpa [#allocation4], 0 }
   0x4   :  { %14 = vsyncpa [#allocation4 + $0x1], 0  ;;  %s1189_s12 = smov 0   ;;  %s1191_s13 = smov 0  }
   0x5   :  { %s1193_s14 = smov 0   ;;  %s1195_s15 = smov 0  }
   0x6   :  { %s1197_s16 = smov 0   ;;  %s1199_s17 = smov 0  }
   0x7 LB: > { %s788_s18 = sadd.s32 4294967295, %s1160_s17   ;;  %s789_s19 = sadd.s32 4294967294, %s1160_s17   ;;  %s1160_s17 = sphi %s1199_s17, %s20_s17   ;;  %s1156_s16 = sphi %s1197_s16, %s1492_s16   ;;  %s1152_s15 = sphi %s1195_s15, %s1491_s15   ;;  %s1148_s14 = sphi %s1193_s14, %s1490_s14   ;;  %s1144_s13 = sphi %s1191_s13, %s1489_s13   ;;  %s1140_s12 = sphi %s1189_s12, %s1488_s12  }
   0x8   : > { %p52_p0 = scmp.ne.s32.totalorder %s1144_s13, %s1140_s12  ;;  %p1223_p1 = scmp.eq.s32.totalorder %s788_s18, 0 }
   0x9   : > { %p1227_p2 = scmp.eq.s32.totalorder %s788_s18, 1  ;;  %p136_p3 = scmp.eq.s32.totalorder %s789_s19, 1 }
   0xa   : > { %p1233_p4 = por %p1223_p1, %p52_p0  ;;  %p790_p5 = scmp.ge.s32.totalorder %s1160_s17, 1 }
   0xb   : > { %p1238_p6 = por %p136_p3, %p52_p0  ;;  %p143_p7 = scmp.lt.s32.totalorder %s1160_s17, 3 }
   0xc   : > { %s1476_s22 = scalar_select %p1233_p4, 1, 0 }
   0xd   : > { %s1477_s23 = scalar_select %p1238_p6, 1, 0 }
   0xe   : > { %p1243_p8 = pnand %p790_p5, %p143_p7  ;;  %s1162_s25 = smov [#allocation5]  }
   0xf   : > { %s157_s26 = sshll.u32 %s1162_s25, 4  ;;  %s32_s28 = sadd.s32 1, %s1156_s16  ;;  %s158_s26 = int_to_ptr.vmem [resolvable:$true] %s157_s26 }
  0x10   : > { %p929_p9 = pneg %p1243_p8  ;;  %s1033_s29 = scalar_lea.vmem %s158_s26, 1024 }
  0x11   : > { %p1034_p13 = scmp.ne.s32.totalorder %s158_s26, %s1033_s29  ;;  %p1041_p5 = scmp.lt.s32.totalorder %s158_s26, %s158_s26 }
  0x12   : > { %p1252_p11 = pnand %p929_p9, %p1223_p1  ;;  %p1042_p7 = scmp.lt.s32.totalorder %s1033_s29, %s1033_s29 }
  0x14   : > { %p1024_p12 = pneg %p1252_p11  ;;  %p1043_p6 = por %p1042_p7, %p1041_p5 }
  0x16   : > { %p1036_p0 = pnand %p1034_p13, %p1024_p12 }
  0x18   : > { %p1037_p3 = pneg %p1036_p0 }
  0x1a   : > { %p1044_p4 = pnand %p1043_p6, %p1037_p3 }
  0x1c   : > { %1047 = shalt.err (!%p1044_p4)
}
  0x1d   : > { %s1472_s30 = smov 64   ;;  %s1473_s4 = smov 4  }
  0x1e   : > { %932 = dma.hbm_to_vmem [thread:$0]  (!%p1252_p11), %s1468_s1, 1024, %s158_s26, [#allocation6], %s1472_s30, %s1472_s30, %s1473_s4  }
  0x1f   : > { %p34_p4 = scmp.ge.s32.totalorder %s32_s28, 2  ;;  %s39_s7 = sadd.s32 1, %s1148_s14 }
  0x20   : > { %p46_p6 = scmp.ne.s32.totalorder %s1148_s14, %s1144_s13  ;;  %p47_p9 = scmp.eq.s32.totalorder %s1160_s17, 0 }
  0x21   : > { %s1494_s28 = smov (%p34_p4, %s32_s28), 0  ;;  %p942_p0 = scmp.lt.s32.totalorder %s1160_s17, 2 }
  0x22   : > { %p1273_p12 = por %p47_p9, %p46_p6  ;;  %p1279_p13 = por %p1227_p2, %p46_p6 }
  0x23   : > { %s36_s10 = ssub.s32 %s1156_s16, %s1494_s28  ;;  %s177_s11 = sand.u32 1, %s1148_s14  }
  0x24   : > { %p37_p11 = scmp.eq.s32.totalorder %s36_s10, 0  ;;  %s794_s18 = sshll.u32 %s177_s11, 7 }
  0x25   : > { %s831_s25 = sshll.u32 %s1156_s16, 11  ;;  %s181_s5 = scalar_lea.vmem [#allocation2], %s794_s18 }
  0x26   : > { %s1288_s19 = scalar_select %p37_p11, %s1148_s14, %s39_s7  }
  0x27   : > { %s187_s29 = scalar_lea.hbm %s1467_s0, %s831_s25  ;;  %s188_s6 = sshll.u32 %s181_s5, 4  ;;  %s189_s6 = int_to_ptr.vmem [resolvable:$true] %s188_s6 }
  0x28   : > { %p1296_p2 = pnand %p942_p0, %p1273_p12  ;;  %s178_s30 = scalar_lea.sflag [#allocation3], %s177_s11 }
  0x29   : > { %s1061_s10 = scalar_lea.vmem %s189_s6, 2048  ;;  %s1165_s7 = smov [#allocation2]  }
  0x2a   : > { %p1050_p3 = pneg %p1296_p2  ;;  %p1062_p5 = scmp.ne.s32.totalorder %s189_s6, %s1061_s10 }
  0x2b   : > { %s1066_s4 = sshll.u32 %s1165_s7, 4  ;;  %s1067_s4 = int_to_ptr.vmem [resolvable:$false] %s1066_s4 }
  0x2c   : > { %p1064_p7 = pnand %p1062_p5, %p1050_p3  ;;  %s1068_s25 = scalar_lea.vmem %s1067_s4, 4096 }
  0x2d   : > { %p1069_p6 = scmp.lt.s32.totalorder %s189_s6, %s1067_s4  ;;  %p1070_p9 = scmp.lt.s32.totalorder %s1068_s25, %s1061_s10 }
  0x2e   : > { %p1065_p4 = pneg %p1064_p7 }
  0x2f   : > { %p1071_p11 = por %p1070_p9, %p1069_p6 }
  0x31   : > { %p1072_p10 = pnand %p1071_p11, %p1065_p4 }
  0x33   : > { %1075 = shalt.err (!%p1072_p10)
}
  0x34   : > { %s1483_s8 = smov 4   ;;  %s1484_s18 = smov 64  }
  0x35   : > { %936 = dma.hbm_to_vmem [thread:$0]  (!%p1296_p2), %s187_s29, 2048, %s189_s6, %s178_s30, %s1484_s18, %s1484_s18, %s1483_s8  }
  0x36   : > { %200 = sbr.rel (%p1243_p8) target bundleno = 336 (0x150), region = 32  ;;  %s1310_s11 = sand.u32 (!%p1243_p8), 1, %s1144_s13  }
  0x37   : > { %s798_s4 = sshll.u32 (!%p1243_p8), %s1310_s11, 7  ;;  %s203_s26 = scalar_lea.sflag (!%p1243_p8), [#allocation3], %s1310_s11 }
  0x38   : > { %s1314_s27 = scalar_lea.vmem (!%p1243_p8), [#allocation2], %s798_s4  ;;  %p1485_p10 = scmp.ne.s32.totalorder (!%p1243_p8), %s1476_s22, 0 }
  0x3b   : > { %1127 = dma.done.wait (%p1485_p10), %s203_s26, 2048  }
  0x3c   : > { %1129 = vsyncadd (%p1485_p10), %s203_s26, 4294965248 }
  0x3d   : > { %1131 = dma.done.wait (%p1223_p1), [#allocation6], 1024  }
  0x3e   : > { %1133 = vsyncadd (%p1223_p1), [#allocation6], 4294966272  ;;  %v998_v0 = vld [vmem:[#allocation5 + $0x38] sm:$0xff]   ;;  %v999_v1 = vld [vmem:[#allocation5 + $0x30] sm:$0xff]   ;;  %s800_s24 = sshll.u32 %s1310_s11, 8  ;;  %s832_s29 = sshll.u32 %s1152_s15, 12 }
  0x3f   : > { %857 = vmatprep.subr.bf16.mxu0 %v998_v0  ;;  %905 = vmatprep.subr.bf16.mxu1 %v998_v0  ;;  %v1000_v2 = vld [vmem:[#allocation5 + $0x28] sm:$0xff]   ;;  %v1001_v3 = vld [vmem:[#allocation5 + $0x20] sm:$0xff]   ;;  %v1002_v6 = vld [vmem:[#allocation5 + $0x18] sm:$0xff]   ;;  %s1350_s30 = scalar_lea.vmem [#allocation7], %s800_s24  ;;  %s1413_s10 = scalar_lea.hbm %s1470_s3, %s832_s29 }
  0x40   : > { %858 = vmatpush3.bf16.msra.mxu0 %v998_v0  ;;  %913 = vmatpush3.bf16.msra.mxu1 %v998_v0  ;;  %v1006_v4 = vld [vmem:[%s1314_s27] sm:$0xff]   ;;  %v1003_v7 = vld [vmem:[#allocation5 + $0x10] sm:$0xff]   ;;  %v1004_v8 = vld [vmem:[#allocation5 + $0x8] sm:$0xff]   ;;  %s681_s5 = sshll.u32 %s1350_s30, 4  ;;  %s667_s15 = scalar_lea.sflag [#allocation4], %s1310_s11  ;;  %s1415_s5 = int_to_ptr.vmem [resolvable:$true] %s681_s5 }
  0x41   : > { %859 = vmatprep.subr.bf16.mxu0 %v999_v1  ;;  %906 = vmatprep.subr.bf16.mxu1 %v999_v1  ;;  %v1007_v5 = vld [vmem:[%s1314_s27 + $0x40] sm:$0xff]   ;;  %v1008_v10 = vld [vmem:[%s1314_s27 + $0x8] sm:$0xff]   ;;  %v1010_v12 = vld [vmem:[%s1314_s27 + $0x10] sm:$0xff]   ;;  %s1076_s7 = scalar_lea.vmem %s1415_s5, 4096  ;;  %s1166_s25 = smov [#allocation7]  }
  0x42   : > { %873 = vmatprep.mubr.bf16.mxu0 %v1006_v4  ;;  %889 = vmatprep.mubr.bf16.mxu1 %v1007_v5  ;;  %v1005_v9 = vld [vmem:[#allocation5] sm:$0xff]   ;;  %v1009_v11 = vld [vmem:[%s1314_s27 + $0x48] sm:$0xff]   ;;  %v1011_v13 = vld [vmem:[%s1314_s27 + $0x50] sm:$0xff]   ;;  %p1077_p1 = scmp.ne.s32.totalorder %s1415_s5, %s1076_s7  ;;  %s1080_s8 = sshll.u32 %s1166_s25, 4  ;;  %s1081_s8 = int_to_ptr.vmem [resolvable:$false] %s1080_s8 }
  0x43   : > { %v1012_v14 = vld [vmem:[%s1314_s27 + $0x18] sm:$0xff]   ;;  %v1014_v16 = vld [vmem:[%s1314_s27 + $0x20] sm:$0xff]   ;;  %v1016_v18 = vld [vmem:[%s1314_s27 + $0x28] sm:$0xff]   ;;  %s1082_s18 = scalar_lea.vmem %s1081_s8, 8192  ;;  %p1083_p0 = scmp.lt.s32.totalorder %s1415_s5, %s1081_s8 }
  0x44   : > { %860 = vmatpush3.bf16.msra.mxu0 %v999_v1  ;;  %914 = vmatpush3.bf16.msra.mxu1 %v999_v1  ;;  %v1013_v15 = vld [vmem:[%s1314_s27 + $0x58] sm:$0xff]   ;;  %v1015_v17 = vld [vmem:[%s1314_s27 + $0x60] sm:$0xff]   ;;  %v1017_v19 = vld [vmem:[%s1314_s27 + $0x68] sm:$0xff]   ;;  %p1078_p8 = pnand %p1077_p1, %p1279_p13  ;;  %p1084_p2 = scmp.lt.s32.totalorder %s1082_s18, %s1076_s7 }
  0x45   : > { %861 = vmatprep.subr.bf16.mxu0 %v1000_v2  ;;  %907 = vmatprep.subr.bf16.mxu1 %v1000_v2  ;;  %v1018_v20 = vld [vmem:[%s1314_s27 + $0x30] sm:$0xff]   ;;  %v1020_v22 = vld [vmem:[%s1314_s27 + $0x38] sm:$0xff]   ;;  %v1343_v24 = vld [vmem:[%s1469_s2] ss:$0 sm:$0xff] }
  0x46   : > { %v1019_v21 = vld [vmem:[%s1314_s27 + $0x70] sm:$0xff]   ;;  %v1021_v23 = vld [vmem:[%s1314_s27 + $0x78] sm:$0xff]   ;;  %p1079_p12 = pneg %p1078_p8  ;;  %p1085_p3 = por %p1084_p2, %p1083_p0 }
  0x48   : > { %862 = vmatpush3.bf16.msra.mxu0 %v1000_v2  ;;  %915 = vmatpush3.bf16.msra.mxu1 %v1000_v2  ;;  %p1086_p5 = pnand %p1085_p3, %p1079_p12 }
  0x49   : > { %863 = vmatprep.subr.bf16.mxu0 %v1001_v3  ;;  %908 = vmatprep.subr.bf16.mxu1 %v1001_v3 }
  0x4c   : > { %864 = vmatpush3.bf16.msra.mxu0 %v1001_v3  ;;  %916 = vmatpush3.bf16.msra.mxu1 %v1001_v3 }
  0x4d   : > { %865 = vmatprep.subr.bf16.mxu0 %v1002_v6  ;;  %909 = vmatprep.subr.bf16.mxu1 %v1002_v6 }
  0x50   : > { %866 = vmatpush3.bf16.msra.mxu0 %v1002_v6  ;;  %917 = vmatpush3.bf16.msra.mxu1 %v1002_v6 }
  0x51   : > { %867 = vmatprep.subr.bf16.mxu0 %v1003_v7  ;;  %910 = vmatprep.subr.bf16.mxu1 %v1003_v7 }
  0x54   : > { %868 = vmatpush3.bf16.msra.mxu0 %v1003_v7  ;;  %918 = vmatpush3.bf16.msra.mxu1 %v1003_v7 }
  0x55   : > { %869 = vmatprep.subr.bf16.mxu0 %v1004_v8  ;;  %911 = vmatprep.subr.bf16.mxu1 %v1004_v8 }
  0x58   : > { %870 = vmatpush3.bf16.msra.mxu0 %v1004_v8  ;;  %919 = vmatpush3.bf16.msra.mxu1 %v1004_v8 }
  0x59   : > { %871 = vmatprep.subr.bf16.mxu0 %v1005_v9  ;;  %912 = vmatprep.subr.bf16.mxu1 %v1005_v9 }
  0x5c   : > { %872 = vmatpush3.bf16.msra.mxu0 %v1005_v9  ;;  %920 = vmatpush3.bf16.msra.mxu1 %v1005_v9 }
  0x5f   : > { %874 = vmatmul.mubr.bf16.vlgmr.msra.gmra.mxu0 %v1008_v10  ;;  %890 = vmatmul.mubr.bf16.vlgmr.msra.gmra.mxu1 %v1009_v11 }
  0x60   : > { %877 = vmatprep.mubr.bf16.mxu0 %v1010_v12  ;;  %893 = vmatprep.mubr.bf16.mxu1 %v1011_v13 }
  0x67   : > { %878 = vmatmul.mubr.bf16.gmra.mxu0 %v1012_v14  ;;  %894 = vmatmul.mubr.bf16.gmra.mxu1 %v1013_v15 }
  0x68   : > { %881 = vmatprep.mubr.bf16.mxu0 %v1014_v16  ;;  %897 = vmatprep.mubr.bf16.mxu1 %v1015_v17 }
  0x6f   : > { %882 = vmatmul.mubr.bf16.gmra.mxu0 %v1016_v18  ;;  %898 = vmatmul.mubr.bf16.gmra.mxu1 %v1017_v19 }
  0x70   : > { %885 = vmatprep.mubr.bf16.mxu0 %v1018_v20  ;;  %901 = vmatprep.mubr.bf16.mxu1 %v1019_v21 }
  0x77   : > { %886 = vmatmul.mubr.bf16.gmra.mxu0 %v1020_v22  ;;  %902 = vmatmul.mubr.bf16.gmra.mxu1 %v1021_v23 }
 0x11f   : > { %v875_v25 = vpop.f32.mrf.mxu0  ;;  %v891_v26 = vpop.f32.mrf.mxu1 }
 0x120   : > { %v484_v27 = vadd.f32 %v875_v25, %v1343_v24  ;;  %v548_v28 = vadd.f32 %v891_v26, %v1343_v24 }
 0x121   : > { %v475_v29 = vpop.f32.mrf.mxu0  ;;  %v539_v30 = vpop.f32.mrf.mxu1 }
 0x122   : > { %v604_v31 = vmax.f32 %v484_v27, 0.0  ;;  %v620_v32 = vmax.f32 %v548_v28, 0.0  ;;  %v476_v33 = vadd.f32 %v1343_v24, %v475_v29  ;;  %v540_v34 = vadd.f32 %v1343_v24, %v539_v30 }
 0x123   : > { %v876_v35 = vpop.f32.mrf.mxu0  ;;  %v892_v36 = vpop.f32.mrf.mxu1 }
 0x124   : > { %636 = vst [vmem:[%s1350_s30 + $0x10] sm:$0xff] %v604_v31  ;;  %652 = vst [vmem:[%s1350_s30 + $0x90] sm:$0xff] %v620_v32  ;;  %v602_v37 = vmax.f32 %v476_v33, 0.0  ;;  %v618_v38 = vmax.f32 %v540_v34, 0.0  ;;  %v487_v39 = vadd.f32 %v876_v35, %v1343_v24  ;;  %v551_v40 = vadd.f32 %v892_v36, %v1343_v24 }
 0x125   : > { %v478_v41 = vpop.f32.mrf.mxu0  ;;  %v542_v42 = vpop.f32.mrf.mxu1 }
 0x126   : > { %634 = vst [vmem:[%s1350_s30] sm:$0xff] %v602_v37  ;;  %650 = vst [vmem:[%s1350_s30 + $0x80] sm:$0xff] %v618_v38  ;;  %v605_v43 = vmax.f32 %v487_v39, 0.0  ;;  %v621_v44 = vmax.f32 %v551_v40, 0.0  ;;  %v479_v45 = vadd.f32 %v1343_v24, %v478_v41  ;;  %v543_v46 = vadd.f32 %v1343_v24, %v542_v42 }
 0x127   : > { %v879_v47 = vpop.f32.mrf.mxu0  ;;  %v895_v48 = vpop.f32.mrf.mxu1 }
 0x128   : > { %637 = vst [vmem:[%s1350_s30 + $0x18] sm:$0xff] %v605_v43  ;;  %653 = vst [vmem:[%s1350_s30 + $0x98] sm:$0xff] %v621_v44  ;;  %v603_v49 = vmax.f32 %v479_v45, 0.0  ;;  %v619_v50 = vmax.f32 %v543_v46, 0.0  ;;  %v500_v51 = vadd.f32 %v879_v47, %v1343_v24  ;;  %v564_v52 = vadd.f32 %v895_v48, %v1343_v24 }
 0x129   : > { %v491_v53 = vpop.f32.mrf.mxu0  ;;  %v555_v54 = vpop.f32.mrf.mxu1 }
 0x12a   : > { %635 = vst [vmem:[%s1350_s30 + $0x8] sm:$0xff] %v603_v49  ;;  %651 = vst [vmem:[%s1350_s30 + $0x88] sm:$0xff] %v619_v50  ;;  %v608_v55 = vmax.f32 %v500_v51, 0.0  ;;  %v624_v56 = vmax.f32 %v564_v52, 0.0  ;;  %v492_v57 = vadd.f32 %v1343_v24, %v491_v53  ;;  %v556_v58 = vadd.f32 %v1343_v24, %v555_v54 }
 0x12b   : > { %v880_v59 = vpop.f32.mrf.mxu0  ;;  %v896_v60 = vpop.f32.mrf.mxu1 }
 0x12c   : > { %640 = vst [vmem:[%s1350_s30 + $0x30] sm:$0xff] %v608_v55  ;;  %656 = vst [vmem:[%s1350_s30 + $0xb0] sm:$0xff] %v624_v56  ;;  %v606_v61 = vmax.f32 %v492_v57, 0.0  ;;  %v622_v62 = vmax.f32 %v556_v58, 0.0  ;;  %v503_v63 = vadd.f32 %v880_v59, %v1343_v24  ;;  %v567_v0 = vadd.f32 %v896_v60, %v1343_v24 }
 0x12d   : > { %v494_v1 = vpop.f32.mrf.mxu0  ;;  %v558_v2 = vpop.f32.mrf.mxu1 }
 0x12e   : > { %638 = vst [vmem:[%s1350_s30 + $0x20] sm:$0xff] %v606_v61  ;;  %654 = vst [vmem:[%s1350_s30 + $0xa0] sm:$0xff] %v622_v62  ;;  %v609_v3 = vmax.f32 %v503_v63, 0.0  ;;  %v625_v4 = vmax.f32 %v567_v0, 0.0  ;;  %v495_v5 = vadd.f32 %v1343_v24, %v494_v1  ;;  %v559_v6 = vadd.f32 %v1343_v24, %v558_v2 }
 0x12f   : > { %v883_v7 = vpop.f32.mrf.mxu0  ;;  %v899_v8 = vpop.f32.mrf.mxu1 }
 0x130   : > { %641 = vst [vmem:[%s1350_s30 + $0x38] sm:$0xff] %v609_v3  ;;  %657 = vst [vmem:[%s1350_s30 + $0xb8] sm:$0xff] %v625_v4  ;;  %v607_v9 = vmax.f32 %v495_v5, 0.0  ;;  %v623_v10 = vmax.f32 %v559_v6, 0.0  ;;  %v516_v11 = vadd.f32 %v883_v7, %v1343_v24  ;;  %v580_v12 = vadd.f32 %v899_v8, %v1343_v24 }
 0x131   : > { %v507_v13 = vpop.f32.mrf.mxu0  ;;  %v571_v14 = vpop.f32.mrf.mxu1 }
 0x132   : > { %639 = vst [vmem:[%s1350_s30 + $0x28] sm:$0xff] %v607_v9  ;;  %655 = vst [vmem:[%s1350_s30 + $0xa8] sm:$0xff] %v623_v10  ;;  %v612_v15 = vmax.f32 %v516_v11, 0.0  ;;  %v628_v16 = vmax.f32 %v580_v12, 0.0  ;;  %v508_v17 = vadd.f32 %v1343_v24, %v507_v13  ;;  %v572_v18 = vadd.f32 %v1343_v24, %v571_v14 }
 0x133   : > { %v884_v19 = vpop.f32.mrf.mxu0  ;;  %v900_v20 = vpop.f32.mrf.mxu1 }
 0x134   : > { %644 = vst [vmem:[%s1350_s30 + $0x50] sm:$0xff] %v612_v15  ;;  %660 = vst [vmem:[%s1350_s30 + $0xd0] sm:$0xff] %v628_v16  ;;  %v610_v21 = vmax.f32 %v508_v17, 0.0  ;;  %v626_v22 = vmax.f32 %v572_v18, 0.0  ;;  %v519_v23 = vadd.f32 %v884_v19, %v1343_v24  ;;  %v583_v25 = vadd.f32 %v900_v20, %v1343_v24 }
 0x135   : > { %v510_v26 = vpop.f32.mrf.mxu0  ;;  %v574_v27 = vpop.f32.mrf.mxu1 }
 0x136   : > { %642 = vst [vmem:[%s1350_s30 + $0x40] sm:$0xff] %v610_v21  ;;  %658 = vst [vmem:[%s1350_s30 + $0xc0] sm:$0xff] %v626_v22  ;;  %v613_v28 = vmax.f32 %v519_v23, 0.0  ;;  %v629_v29 = vmax.f32 %v583_v25, 0.0  ;;  %v511_v30 = vadd.f32 %v1343_v24, %v510_v26  ;;  %v575_v31 = vadd.f32 %v1343_v24, %v574_v27 }
 0x137   : > { %v887_v32 = vpop.f32.mrf.mxu0  ;;  %v903_v33 = vpop.f32.mrf.mxu1 }
 0x138   : > { %645 = vst [vmem:[%s1350_s30 + $0x58] sm:$0xff] %v613_v28  ;;  %661 = vst [vmem:[%s1350_s30 + $0xd8] sm:$0xff] %v629_v29  ;;  %v611_v34 = vmax.f32 %v511_v30, 0.0  ;;  %v627_v35 = vmax.f32 %v575_v31, 0.0  ;;  %v532_v36 = vadd.f32 %v887_v32, %v1343_v24  ;;  %v596_v37 = vadd.f32 %v903_v33, %v1343_v24 }
 0x139   : > { %v523_v38 = vpop.f32.mrf.mxu0  ;;  %v587_v39 = vpop.f32.mrf.mxu1 }
 0x13a   : > { %643 = vst [vmem:[%s1350_s30 + $0x48] sm:$0xff] %v611_v34  ;;  %659 = vst [vmem:[%s1350_s30 + $0xc8] sm:$0xff] %v627_v35  ;;  %v616_v40 = vmax.f32 %v532_v36, 0.0  ;;  %v632_v41 = vmax.f32 %v596_v37, 0.0  ;;  %v524_v42 = vadd.f32 %v1343_v24, %v523_v38  ;;  %v588_v43 = vadd.f32 %v1343_v24, %v587_v39 }
 0x13b   : > { %v888_v44 = vpop.f32.mrf.mxu0  ;;  %v904_v45 = vpop.f32.mrf.mxu1 }
 0x13c   : > { %648 = vst [vmem:[%s1350_s30 + $0x70] sm:$0xff] %v616_v40  ;;  %664 = vst [vmem:[%s1350_s30 + $0xf0] sm:$0xff] %v632_v41  ;;  %v614_v46 = vmax.f32 %v524_v42, 0.0  ;;  %v630_v47 = vmax.f32 %v588_v43, 0.0  ;;  %v535_v48 = vadd.f32 %v888_v44, %v1343_v24  ;;  %v599_v49 = vadd.f32 %v904_v45, %v1343_v24 }
 0x13d   : > { %v526_v50 = vpop.f32.mrf.mxu0  ;;  %v590_v51 = vpop.f32.mrf.mxu1 }
 0x13e   : > { %646 = vst [vmem:[%s1350_s30 + $0x60] sm:$0xff] %v614_v46  ;;  %662 = vst [vmem:[%s1350_s30 + $0xe0] sm:$0xff] %v630_v47  ;;  %v617_v52 = vmax.f32 %v535_v48, 0.0  ;;  %v633_v53 = vmax.f32 %v599_v49, 0.0  ;;  %v527_v54 = vadd.f32 %v1343_v24, %v526_v50  ;;  %v591_v55 = vadd.f32 %v1343_v24, %v590_v51 }
 0x140   : > { %649 = vst [vmem:[%s1350_s30 + $0x78] sm:$0xff] %v617_v52  ;;  %665 = vst [vmem:[%s1350_s30 + $0xf8] sm:$0xff] %v633_v53  ;;  %v615_v56 = vmax.f32 %v527_v54, 0.0  ;;  %v631_v57 = vmax.f32 %v591_v55, 0.0 }
 0x142   : > { %647 = vst [vmem:[%s1350_s30 + $0x68] sm:$0xff] %v615_v56  ;;  %663 = vst [vmem:[%s1350_s30 + $0xe8] sm:$0xff] %v631_v57 }
 0x143   : > { %1089 = shalt.err (!%p1086_p5)
}
 0x144   : > { %s1090_s4 = scalar_lea.hbm %s1413_s10, 4096  ;;  %s1094_s20 = scalar_lea.hbm %s1470_s3, 8192 }
 0x145   : > { %p1091_p7 = scmp.ne.s32.totalorder %s1413_s10, %s1090_s4  ;;  %p1095_p9 = scmp.lt.s32.totalorder %s1413_s10, %s1470_s3 }
 0x146   : > { %p1096_p11 = scmp.lt.s32.totalorder %s1094_s20, %s1090_s4 }
 0x147   : > { %p1092_p4 = pnand %p1091_p7, %p1279_p13 }
 0x148   : > { %p1097_p10 = por %p1096_p11, %p1095_p9 }
 0x149   : > { %p1093_p6 = pneg %p1092_p4 }
 0x14b   : > { %p1098_p1 = pnand %p1097_p10, %p1093_p6 }
 0x14d   : > { %1101 = shalt.err (!%p1098_p1)
}
 0x14e   : > { %s1167_s30 = smov 128   ;;  %s1168_s29 = smov 8  }
 0x14f   : > { %927 = dma.vmem_to_hbm [thread:$0]  (%p1279_p13), %s1415_s5, 4096, %s1413_s10, %s667_s15, %s1167_s30, %s1167_s30, %s1168_s29  }
 0x150 PF: > { %s696_s6 = sand.u32 1, %s1140_s12   ;;  %p1486_p8 = scmp.ne.s32.totalorder %s1477_s23, 0 }
 0x151   : > { %p1487_p12 = scmp.ge.s32.totalorder %s1160_s17, 2  ;;  %s697_s21 = scalar_lea.sflag [#allocation4], %s696_s6 }
 0x153   : > { %p938_p0 = pnand %p1487_p12, %p1486_p8 }
 0x155   : > { %p939_p2 = pneg %p938_p0 }
 0x157   : > { %1135 = dma.done.wait (%p939_p2), %s697_s21, 4096  }
 0x158   : > { %1137 = vsyncadd (%p939_p2), %s697_s21, 4294963200  ;;  %s20_s17 = sadd.s32 1, %s1160_s17   ;;  %s1488_s12 = smov %s1144_s13 }
 0x159   : > { %p17_p3 = scmp.ge.s32.totalorder %s20_s17, 4   ;;  %s1489_s13 = smov %s1148_s14 }
 0x15a   : > { %s1490_s14 = smov %s1288_s19  ;;  %s1491_s15 = smov %s1156_s16 }
 0x15b   : > { %s1492_s16 = smov %s1494_s28  ;;  %19 = sbr.rel (!%p17_p3) target bundleno = 7 (0x7), region = 85 }
 0x160   :  { %702 = vsyncpa [#allocation3], 1 }
 0x161   :  { %704 = vsyncpa [#allocation3 + $0x1], 1 }
 0x162   :  { %705 = vsyncpa [#allocation6], 1 }
 0x163   :  { %706 = vsyncpa [#allocation4], 1 }
 0x164   :  { %708 = vsyncpa [#allocation4 + $0x1], 1 }

</bundles_post_ra>
